<compile_context>
chip_gen: v6e
topology: v6e:2x2x1
jax: 0.10.0
libtpu: 0.0.40
codegen_flags: <defaults>
</compile_context>

<pallas_src>
import math
import functools

import jax
import jax.numpy as jnp
from jax.experimental import pallas as pl
from jax.experimental.pallas import tpu as pltpu


_VMEM_LIMIT = 48 * 1024 * 1024  # safe on v5e (128 MiB), v6e (128 MiB), v7x (64 MiB)


# ---------------------------------------------------------------------------
# Fused tiled matmul kernel:
#   out = [residual +] [postLN(] [gelu(] [preLN(x)] @ w [+ bias] [)] [)]
# ---------------------------------------------------------------------------

def _gelu_tanh(y):
    c = math.sqrt(2.0 / math.pi)
    return 0.5 * y * (1.0 + jnp.tanh(c * (y + 0.044715 * (y * y * y))))


def _fused_matmul_kernel(*refs, has_bias, has_prenorm, has_postnorm, has_residual,
                         activation, eps):
    refs = list(refs)
    x_ref = refs.pop(0)
    w_ref = refs.pop(0)
    b_ref = refs.pop(0) if has_bias else None
    if has_prenorm:
        pre_g_ref = refs.pop(0)
        pre_b_ref = refs.pop(0)
    if has_postnorm:
        post_g_ref = refs.pop(0)
        post_b_ref = refs.pop(0)
    res_ref = refs.pop(0) if has_residual else None
    o_ref = refs.pop(0)
    acc_ref = refs.pop(0)

    k_idx = pl.program_id(2)
    nk = pl.num_programs(2)

    @pl.when(k_idx == 0)
    def _():
        acc_ref[...] = jnp.zeros_like(acc_ref)

    x = x_ref[...]
    if has_prenorm:
        # LayerNorm prologue (requires the full K row in this tile); f32 statistics.
        xf = x.astype(jnp.float32)
        mean = jnp.mean(xf, axis=-1, keepdims=True)
        xc = xf - mean
        var = jnp.mean(xc * xc, axis=-1, keepdims=True)
        x = (xc * jax.lax.rsqrt(var + eps)) * pre_g_ref[...] + pre_b_ref[...]

    xb = x.astype(jnp.bfloat16)
    wb = w_ref[...].astype(jnp.bfloat16)
    acc_ref[...] += jnp.dot(xb, wb, preferred_element_type=jnp.float32)

    @pl.when(k_idx == nk - 1)
    def _():
        y = acc_ref[...]
        if has_bias:
            y = y + b_ref[...]
        if activation == "gelu":
            y = _gelu_tanh(y)
        if has_postnorm:
            mean = jnp.mean(y, axis=-1, keepdims=True)
            yc = y - mean
            var = jnp.mean(yc * yc, axis=-1, keepdims=True)
            y = (yc * jax.lax.rsqrt(var + eps)) * post_g_ref[...] + post_b_ref[...]
        if has_residual:
            y = y + res_ref[...].astype(jnp.float32)
        o_ref[...] = y.astype(o_ref.dtype)


def _pick_k_tile(k_dim, target):
    """Pick a K tile that divides K exactly (no garbage in the reduction)."""
    if k_dim <= target:
        return k_dim
    for cand in range(target, 127, -128):
        if k_dim % cand == 0:
            return cand
    return k_dim


def fused_matmul(x, w, bias=None, *, prenorm=None, postnorm=None, activation=None,
                 residual=None, out_dtype=jnp.float32, eps=1e-5,
                 tm=256, tn=256, tk=512):
    """x:[M,K] @ w:[K,N] with optional fused pre-LN, bias, GELU, post-LN, residual."""
    M, K = x.shape
    N = w.shape[1]

    tm = M if M <= tm else tm                    # tm=256 is a multiple of 8
    tn = N if N <= tn else tn                    # tn=256 is a multiple of 128 (MXU tile)
    if postnorm is not None:
        tn = N                                   # post-LN needs the whole output row
    if prenorm is not None:
        tk = K                                   # pre-LN needs the whole input row
    else:
        tk = _pick_k_tile(K, tk)
    nm, nn, nk = pl.cdiv(M, tm), pl.cdiv(N, tn), pl.cdiv(K, tk)

    inputs = [x, w]
    in_specs = [
        pl.BlockSpec((tm, tk), lambda i, j, k: (i, k)),
        pl.BlockSpec((tk, tn), lambda i, j, k: (k, j)),
    ]
    if bias is not None:
        inputs.append(bias.reshape(1, N).astype(jnp.float32))
        in_specs.append(pl.BlockSpec((1, tn), lambda i, j, k: (0, j)))
    if prenorm is not None:
        g, b = prenorm
        inputs += [g.reshape(1, K).astype(jnp.float32),
                   b.reshape(1, K).astype(jnp.float32)]
        in_specs += [pl.BlockSpec((1, K), lambda i, j, k: (0, 0))] * 2
    if postnorm is not None:
        g, b = postnorm
        inputs += [g.reshape(1, N).astype(jnp.float32),
                   b.reshape(1, N).astype(jnp.float32)]
        in_specs += [pl.BlockSpec((1, N), lambda i, j, k: (0, 0))] * 2
    if residual is not None:
        inputs.append(residual)
        in_specs.append(pl.BlockSpec((tm, tn), lambda i, j, k: (i, j)))

    kernel = functools.partial(
        _fused_matmul_kernel,
        has_bias=bias is not None,
        has_prenorm=prenorm is not None,
        has_postnorm=postnorm is not None,
        has_residual=residual is not None,
        activation=activation,
        eps=eps,
    )

    return pl.pallas_call(
        kernel,
        out_shape=jax.ShapeDtypeStruct((M, N), out_dtype),
        grid=(nm, nn, nk),
        in_specs=in_specs,
        out_specs=pl.BlockSpec((tm, tn), lambda i, j, k: (i, j)),
        scratch_shapes=[pltpu.VMEM((tm, tn), jnp.float32)],
        compiler_params=pltpu.CompilerParams(
            dimension_semantics=("parallel", "parallel", "arbitrary"),
            vmem_limit_bytes=_VMEM_LIMIT),
    )(*inputs)


# ---------------------------------------------------------------------------
# Flash-style multi-head attention on lane-dense [B, N, heads*dim_head] tiles
# ---------------------------------------------------------------------------

def _flash_attn_kernel(q_ref, k_ref, v_ref, o_ref, acc_sc, m_sc, l_sc, *,
                       heads, dh, scale, seq_len, tkv):
    kv_idx = pl.program_id(2)
    nkv = pl.num_programs(2)

    @pl.when(kv_idx == 0)
    def _():
        m_sc[...] = jnp.full(m_sc.shape, -jnp.inf, dtype=m_sc.dtype)
        l_sc[...] = jnp.zeros(l_sc.shape, dtype=l_sc.dtype)
        acc_sc[...] = jnp.zeros(acc_sc.shape, dtype=acc_sc.dtype)

    qt = q_ref[...]           # [tq, heads*dh]  (bf16)
    kt = k_ref[...]           # [tkv, heads*dh]
    vt = v_ref[...]

    needs_mask = (seq_len % tkv) != 0
    if needs_mask:
        col = jax.lax.broadcasted_iota(jnp.int32, (1, kt.shape[0]), 1) + kv_idx * tkv
        kv_valid = col < seq_len

    for h in range(heads):
        sl = slice(h * dh, (h + 1) * dh)
        # pre-scale q (N*Dh work) instead of scaling the [tq,tkv] score matrix
        qh = (qt[:, sl].astype(jnp.float32) * scale).astype(jnp.bfloat16)
        kh = kt[:, sl]
        vh = vt[:, sl]
        s = jax.lax.dot_general(qh, kh, (((1,), (1,)), ((), ())),
                                preferred_element_type=jnp.float32)   # [tq, tkv] f32
        if needs_mask:
            s = jnp.where(kv_valid, s, -jnp.inf)

        m_prev = m_sc[:, h:h + 1]
        m_new = jnp.maximum(m_prev, jnp.max(s, axis=-1, keepdims=True))
        alpha = jnp.exp(m_prev - m_new)
        p = jnp.exp(s - m_new)
        l_sc[:, h:h + 1] = alpha * l_sc[:, h:h + 1] + jnp.sum(p, axis=-1, keepdims=True)
        acc_sc[:, sl] = alpha * acc_sc[:, sl] + jnp.dot(
            p.astype(jnp.bfloat16), vh, preferred_element_type=jnp.float32)
        m_sc[:, h:h + 1] = m_new

    @pl.when(kv_idx == nkv - 1)
    def _():
        for h in range(heads):
            sl = slice(h * dh, (h + 1) * dh)
            inv = pl.reciprocal(l_sc[:, h:h + 1], approx=True)
            o_ref[:, sl] = (acc_sc[:, sl] * inv).astype(o_ref.dtype)


def flash_attention(q, k, v, heads):
    """q,k,v: [B, N, heads*dim_head] (bf16) -> [B, N, heads*dim_head] (bf16)."""
    B, N, HD = q.shape
    dh = HD // heads
    scale = dh ** -0.5

    tq = N if N <= 256 else 256
    tkv = N if N <= 256 else 256
    nq, nkv = pl.cdiv(N, tq), pl.cdiv(N, tkv)

    kernel = functools.partial(_flash_attn_kernel, heads=heads, dh=dh, scale=scale,
                               seq_len=N, tkv=tkv)
    return pl.pallas_call(
        kernel,
        out_shape=jax.ShapeDtypeStruct((B, N, HD), jnp.bfloat16),
        grid=(B, nq, nkv),
        in_specs=[
            pl.BlockSpec((None, tq, HD), lambda b, qi, ki: (b, qi, 0)),
            pl.BlockSpec((None, tkv, HD), lambda b, qi, ki: (b, ki, 0)),
            pl.BlockSpec((None, tkv, HD), lambda b, qi, ki: (b, ki, 0)),
        ],
        out_specs=pl.BlockSpec((None, tq, HD), lambda b, qi, ki: (b, qi, 0)),
        scratch_shapes=[
            pltpu.VMEM((tq, HD), jnp.float32),       # output accumulator
            pltpu.VMEM((tq, heads), jnp.float32),    # running max per head
            pltpu.VMEM((tq, heads), jnp.float32),    # running sum per head
        ],
        compiler_params=pltpu.CompilerParams(
            dimension_semantics=("parallel", "parallel", "arbitrary"),
            vmem_limit_bytes=_VMEM_LIMIT),
    )(q, k, v)


# ---------------------------------------------------------------------------
# Conv2d via im2col (bf16 patches) + fused matmul, PyTorch NCHW semantics
# ---------------------------------------------------------------------------

def im2col(x, kh, kw, stride, padding):
    B, C, H, W = x.shape
    xp = jnp.pad(x, ((0, 0), (0, 0), (padding, padding), (padding, padding)))
    xp = xp.astype(jnp.bfloat16)
    oh = (H + 2 * padding - kh) // stride + 1
    ow = (W + 2 * padding - kw) // stride + 1
    cols = []
    for dy in range(kh):
        for dx in range(kw):
            cols.append(xp[:, :, dy:dy + stride * oh:stride, dx:dx + stride * ow:stride])
    col = jnp.stack(cols, axis=2)                       # [B, C, kh*kw, oh, ow]
    col = col.reshape(B, C * kh * kw, oh, ow)           # index = c*(kh*kw) + dy*kw + dx
    col = col.transpose(0, 2, 3, 1).reshape(B * oh * ow, C * kh * kw)
    return col, oh, ow


# ---------------------------------------------------------------------------
# SerialBlock forward
# ---------------------------------------------------------------------------

def serial_block_forward(x_img, cls_tokens, params, *, heads, stride, padding):
    """x_img: [B, Cin, H, W] f32, cls_tokens: [B, 1, Cin] f32 -> [B, 1+(H/stride)^2, Cout]."""
    B = x_img.shape[0]
    kh = params['conv_w'].shape[2]

    # conv_embed: Conv2d + 'b c h w -> b (h w) c' + LayerNorm, LN fused into the epilogue
    col, oh, ow = im2col(x_img, kh, kh, stride, padding)
    cout = params['conv_w'].shape[0]
    w_conv = params['conv_w'].reshape(cout, -1).T        # [Cin*kh*kw, Cout] bf16
    y = fused_matmul(col, w_conv, params['conv_b'],
                     postnorm=(params['embed_ln_g'], params['embed_ln_b']),
                     out_dtype=jnp.float32)
    y = y.reshape(B, oh * ow, cout)

    # cls_embed
    cls = fused_matmul(cls_tokens.reshape(B, -1), params['cls_w'], params['cls_b'],
                       out_dtype=jnp.float32).reshape(B, 1, cout)

    x = jnp.concatenate([cls, y], axis=1)                # [B, N, Cout] f32 residual stream
    Bn, Nn, Cn = x.shape
    x = x.reshape(Bn * Nn, Cn)

    for lp in params['layers']:
        # PreNorm(ln1) fused into the (bias-free) qkv projection; bf16 output
        qkv = fused_matmul(x, lp['attn']['w_qkv'],
                           prenorm=(lp['ln1_g'], lp['ln1_b']),
                           out_dtype=jnp.bfloat16)
        q_a, k_a, v_a = jnp.split(qkv.reshape(Bn, Nn, -1), 3, axis=-1)
        attn = flash_attention(q_a, k_a, v_a, heads)     # [B, N, inner] bf16
        # out-projection with the residual add fused in the epilogue (f32 residual stream)
        x = fused_matmul(attn.reshape(Bn * Nn, -1), lp['attn']['w_out'],
                         lp['attn']['b_out'], residual=x, out_dtype=jnp.float32)

        # FeedForward: PreNorm(ln2)+W1+GELU fused; W2 + residual fused
        h = fused_matmul(x, lp['ff']['w1'], lp['ff']['b1'],
                         prenorm=(lp['ln2_g'], lp['ln2_b']),
                         activation="gelu", out_dtype=jnp.bfloat16)
        x = fused_matmul(h, lp['ff']['w2'], lp['ff']['b2'],
                         residual=x, out_dtype=jnp.float32)

    return x.reshape(Bn, Nn, Cn)


# ---------------------------------------------------------------------------
# Deterministic synthetic parameters (torch-shape-compatible; weights stored bf16)
# ---------------------------------------------------------------------------

def _normal(key, shape, std=0.02):
    return std * jax.random.normal(key, shape, dtype=jnp.float32)


def init_serial_block_params(key, in_channels, out_channels, depth, heads, scale,
                             conv_kernel):
    dim_head = out_channels // heads
    inner = dim_head * heads
    key, k1, k2 = jax.random.split(key, 3)
    params = {
        'cls_w': _normal(k1, (in_channels, out_channels)).astype(jnp.bfloat16),
        'cls_b': jnp.zeros((out_channels,), jnp.float32),
        'conv_w': _normal(k2, (out_channels, in_channels, conv_kernel, conv_kernel)
                          ).astype(jnp.bfloat16),
        'conv_b': jnp.zeros((out_channels,), jnp.float32),
        'embed_ln_g': jnp.ones((out_channels,), jnp.float32),
        'embed_ln_b': jnp.zeros((out_channels,), jnp.float32),
    }
    layers = []
    for _ in range(depth):
        key, ka, kb, kc, kd = jax.random.split(key, 5)
        layers.append({
            'ln1_g': jnp.ones((out_channels,), jnp.float32),
            'ln1_b': jnp.zeros((out_channels,), jnp.float32),
            'attn': {'w_qkv': _normal(ka, (out_channels, inner * 3)).astype(jnp.bfloat16),
                     'w_out': _normal(kb, (inner, out_channels)).astype(jnp.bfloat16),
                     'b_out': jnp.zeros((out_channels,), jnp.float32)},
            'ln2_g': jnp.ones((out_channels,), jnp.float32),
            'ln2_b': jnp.zeros((out_channels,), jnp.float32),
            'ff': {'w1': _normal(kc, (out_channels, out_channels * scale)).astype(jnp.bfloat16),
                   'b1': jnp.zeros((out_channels * scale,), jnp.float32),
                   'w2': _normal(kd, (out_channels * scale, out_channels)).astype(jnp.bfloat16),
                   'b2': jnp.zeros((out_channels,), jnp.float32)},
        })
    params['layers'] = layers
    return params


# ---------------------------------------------------------------------------

if __name__ == "__main__":
    # Small config consistent with SerialBlock defaults: depth=2, nheads=8, scale=8,
    # conv_kernel=7, stride=2.
    B, Cin, IMG = 2, 4, 16
    Cout, depth, heads, scale = 16, 2, 8, 8
    conv_kernel, stride = 7, 2
    padding = (conv_kernel - 1) // 2

    key = jax.random.PRNGKey(0)
    key, kp, kx, kc = jax.random.split(key, 4)
    params = init_serial_block_params(kp, Cin, Cout, depth, heads, scale, conv_kernel)
    x = jax.random.normal(kx, (B, Cin, IMG, IMG), jnp.float32)     # NCHW, like PyTorch
    cls_tokens = jax.random.normal(kc, (B, 1, Cin), jnp.float32)

    out = serial_block_forward(x, cls_tokens, params,
                               heads=heads, stride=stride, padding=padding)
    out = jax.block_until_ready(out)

    feat = IMG // stride
    assert out.shape == (B, feat * feat + 1, Cout), out.shape
    assert bool(jnp.all(jnp.isfinite(out))), "non-finite output"
    print("KERNEL_OK")
</pallas_src>

<mosaic_0001>
module attributes {stable_mosaic.version = 11 : i64} {
  func.func @_fused_matmul_kernel(%arg0: i32, %arg1: i32, %arg2: i32, %arg3: memref<128x196xbf16, #tpu.memory_space<vmem>>, %arg4: memref<196x16xbf16, #tpu.memory_space<vmem>>, %arg5: memref<1x16xf32, #tpu.memory_space<vmem>>, %arg6: memref<1x16xf32, #tpu.memory_space<vmem>>, %arg7: memref<1x16xf32, #tpu.memory_space<vmem>>, %arg8: memref<128x16xf32, #tpu.memory_space<vmem>>, %arg9: memref<128x16xf32, #tpu.memory_space<vmem>>) attributes {dimension_semantics = [#tpu.dimension_semantics<parallel>, #tpu.dimension_semantics<parallel>, #tpu.dimension_semantics<arbitrary>], iteration_bounds = array<i64: 1, 1, 1>, scalar_prefetch = 0 : i64, scratch_operands = 1 : i64, tpu.core_type = #tpu.core_type<tc>, window_params = [{transform_indices = @transform_0, window_bounds = array<i64: 128, 196>}, {transform_indices = @transform_1, window_bounds = array<i64: 196, 16>}, {transform_indices = @transform_2, window_bounds = array<i64: 1, 16>}, {pipeline_mode = #tpu.pipeline_mode<synchronous>, transform_indices = @transform_3, window_bounds = array<i64: 1, 16>}, {pipeline_mode = #tpu.pipeline_mode<synchronous>, transform_indices = @transform_4, window_bounds = array<i64: 1, 16>}, {transform_indices = @transform_5, window_bounds = array<i64: 128, 16>}]} {
    %c0_i32 = arith.constant 0 : i32
    %0 = arith.cmpi eq, %arg2, %c0_i32 : i32
    %1 = arith.extui %0 : i1 to i32
    %c0_i32_0 = arith.constant 0 : i32
    %2 = arith.cmpi ne, %1, %c0_i32_0 : i32
    scf.if %2 {
      %cst_10 = arith.constant 0.000000e+00 : f32
      %12 = vector.broadcast %cst_10 : f32 to vector<128x16xf32>
      %c0_11 = arith.constant 0 : index
      %c0_12 = arith.constant 0 : index
      %13 = vector.load %arg9[%c0_11, %c0_12] : memref<128x16xf32, #tpu.memory_space<vmem>>, vector<128x16xf32>
      tpu.vector_store %arg9[%c0_11, %c0_12], %12 {strides = array<i32>} : memref<128x16xf32, #tpu.memory_space<vmem>>, vector<128x16xf32>,
    } else {
    }
    %c0 = arith.constant 0 : index
    %c0_1 = arith.constant 0 : index
    %3 = vector.load %arg3[%c0, %c0_1] : memref<128x196xbf16, #tpu.memory_space<vmem>>, vector<128x196xbf16>
    %c0_2 = arith.constant 0 : index
    %c0_3 = arith.constant 0 : index
    %4 = vector.load %arg4[%c0_2, %c0_3] : memref<196x16xbf16, #tpu.memory_space<vmem>>, vector<196x16xbf16>
    %c0_4 = arith.constant 0 : index
    %c0_5 = arith.constant 0 : index
    %5 = vector.load %arg9[%c0_4, %c0_5] : memref<128x16xf32, #tpu.memory_space<vmem>>, vector<128x16xf32>
    %cst = arith.constant dense<0.000000e+00> : vector<128x16xf32>
    %6 = tpu.matmul %3, %4, %cst {dimension_numbers = #tpu.dot_dimension_numbers<[1], [0], [0], [1], [0, 0, 1, 1], [], []>} : vector<128x196xbf16>, vector<196x16xbf16>, vector<128x16xf32> -> vector<128x16xf32>
    %7 = arith.addf %5, %6 : vector<128x16xf32>
    %c0_6 = arith.constant 0 : index
    %c0_7 = arith.constant 0 : index
    %8 = vector.load %arg9[%c0_6, %c0_7] : memref<128x16xf32, #tpu.memory_space<vmem>>, vector<128x16xf32>
    tpu.vector_store %arg9[%c0_6, %c0_7], %7 {strides = array<i32>} : memref<128x16xf32, #tpu.memory_space<vmem>>, vector<128x16xf32>,
    %c0_i32_8 = arith.constant 0 : i32
    %9 = arith.cmpi eq, %arg2, %c0_i32_8 : i32
    %10 = arith.extui %9 : i1 to i32
    %c0_i32_9 = arith.constant 0 : i32
    %11 = arith.cmpi ne, %10, %c0_i32_9 : i32
    scf.if %11 {
      %c0_10 = arith.constant 0 : index
      %c0_11 = arith.constant 0 : index
      %12 = vector.load %arg9[%c0_10, %c0_11] : memref<128x16xf32, #tpu.memory_space<vmem>>, vector<128x16xf32>
      %c0_12 = arith.constant 0 : index
      %c0_13 = arith.constant 0 : index
      %13 = vector.load %arg5[%c0_12, %c0_13] : memref<1x16xf32, #tpu.memory_space<vmem>>, vector<1x16xf32>
      %14 = vector.broadcast %13 : vector<1x16xf32> to vector<128x16xf32>
      %15 = arith.addf %12, %14 : vector<128x16xf32>
      %cst_14 = arith.constant dense<0.000000e+00> : vector<128xf32>
      %16 = vector.multi_reduction <add>, %15, %cst_14 [1] : vector<128x16xf32> to vector<128xf32>
      %17 = vector.shape_cast %16 : vector<128xf32> to vector<128x1xf32>
      %cst_15 = arith.constant 1.600000e+01 : f32
      %18 = vector.broadcast %cst_15 : f32 to vector<128x1xf32>
      %19 = arith.divf %17, %18 : vector<128x1xf32>
      %20 = vector.broadcast %19 : vector<128x1xf32> to vector<128x16xf32>
      %21 = arith.subf %15, %20 : vector<128x16xf32>
      %22 = arith.mulf %21, %21 : vector<128x16xf32>
      %cst_16 = arith.constant dense<0.000000e+00> : vector<128xf32>
      %23 = vector.multi_reduction <add>, %22, %cst_16 [1] : vector<128x16xf32> to vector<128xf32>
      %24 = vector.shape_cast %23 : vector<128xf32> to vector<128x1xf32>
      %cst_17 = arith.constant 1.600000e+01 : f32
      %25 = vector.broadcast %cst_17 : f32 to vector<128x1xf32>
      %26 = arith.divf %24, %25 : vector<128x1xf32>
      %cst_18 = arith.constant 9.99999974E-6 : f32
      %27 = vector.broadcast %cst_18 : f32 to vector<128x1xf32>
      %28 = arith.addf %26, %27 : vector<128x1xf32>
      %29 = math.rsqrt %28 : vector<128x1xf32>
      %30 = vector.broadcast %29 : vector<128x1xf32> to vector<128x16xf32>
      %31 = arith.mulf %21, %30 : vector<128x16xf32>
      %c0_19 = arith.constant 0 : index
      %c0_20 = arith.constant 0 : index
      %32 = vector.load %arg6[%c0_19, %c0_20] : memref<1x16xf32, #tpu.memory_space<vmem>>, vector<1x16xf32>
      %33 = vector.broadcast %32 : vector<1x16xf32> to vector<128x16xf32>
      %34 = arith.mulf %31, %33 : vector<128x16xf32>
      %c0_21 = arith.constant 0 : index
      %c0_22 = arith.constant 0 : index
      %35 = vector.load %arg7[%c0_21, %c0_22] : memref<1x16xf32, #tpu.memory_space<vmem>>, vector<1x16xf32>
      %36 = vector.broadcast %35 : vector<1x16xf32> to vector<128x16xf32>
      %37 = arith.addf %34, %36 : vector<128x16xf32>
      %c0_23 = arith.constant 0 : index
      %c0_24 = arith.constant 0 : index
      %38 = vector.load %arg8[%c0_23, %c0_24] : memref<128x16xf32, #tpu.memory_space<vmem>>, vector<128x16xf32>
      tpu.vector_store %arg8[%c0_23, %c0_24], %37 {strides = array<i32>} : memref<128x16xf32, #tpu.memory_space<vmem>>, vector<128x16xf32>,
    } else {
    }
    return
  }
  func.func @transform_0(%arg0: i32, %arg1: i32, %arg2: i32) -> (i32, i32) {
    %c0_i32 = arith.constant 0 : i32
    return %arg0, %arg2 : i32, i32
  }
  func.func @transform_1(%arg0: i32, %arg1: i32, %arg2: i32) -> (i32, i32) {
    %c0_i32 = arith.constant 0 : i32
    return %arg2, %arg1 : i32, i32
  }
  func.func @transform_2(%arg0: i32, %arg1: i32, %arg2: i32) -> (i32, i32) {
    %c0_i32 = arith.constant 0 : i32
    %c0_i32_0 = arith.constant 0 : i32
    return %c0_i32, %arg1 : i32, i32
  }
  func.func @transform_3(%arg0: i32, %arg1: i32, %arg2: i32) -> (i32, i32) {
    %c0_i32 = arith.constant 0 : i32
    %c0_i32_0 = arith.constant 0 : i32
    %c0_i32_1 = arith.constant 0 : i32
    return %c0_i32, %c0_i32_0 : i32, i32
  }
  func.func @transform_4(%arg0: i32, %arg1: i32, %arg2: i32) -> (i32, i32) {
    %c0_i32 = arith.constant 0 : i32
    %c0_i32_0 = arith.constant 0 : i32
    %c0_i32_1 = arith.constant 0 : i32
    return %c0_i32, %c0_i32_0 : i32, i32
  }
  func.func @transform_5(%arg0: i32, %arg1: i32, %arg2: i32) -> (i32, i32) {
    %c0_i32 = arith.constant 0 : i32
    return %arg0, %arg1 : i32, i32
  }
}

</mosaic_0001>

<bundles_post_ra>
// kernel: tpu_custom_call.1
= control target key start
LH: loop header
LB: loop body
LE: loop exit
PB: predicated region body
PF: predicated region fallthrough
CT: control target
= control target key end

     0   :  { %vm25_vm0 = vcmask 130048   ;;  %v859_v0 = vmov 0   ;;  %v860_v2 = vmov 0.0   ;;  %vm246_vm1 = vcmask 556032   ;;  %s1347_s1 = inlined_call_operand.vmem [shape: bf16[196,16], index: 1, kind: input, shape index: {}]   ;;  %s1348_s0 = inlined_call_operand.vmem [shape: bf16[128,196], index: 0, kind: input, shape index: {}]   ;;  %s1349_s2 = inlined_call_operand.vmem [shape: f32[1,16], index: 2, kind: input, shape index: {}]   ;;  %s1350_s3 = inlined_call_operand.vmem [shape: f32[1,16], index: 3, kind: input, shape index: {}]   ;;  %s1351_s4 = inlined_call_operand.vmem [shape: f32[1,16], index: 4, kind: input, shape index: {}]   ;;  %s1352_s5 = inlined_call_operand.vmem [shape: f32[128,16], index: 5, kind: output, shape index: {}]  }
   0x1   :  { %275 = vmatprep.subr.bf16.mxu0 %v859_v0  ;;  %762 = vmatprep.subr.bf16.mxu1 %v859_v0  ;;  %v790_v1 = vld [vmem:[%s1347_s1 + $0x38] sm:$0xff]   ;;  %26 = vst.msk [vmem:[#allocation2] sm:$0xff] %vm25_vm0, %v860_v2  ;;  %27 = vst.msk [vmem:[#allocation2 + $0x8] sm:$0xff] %vm25_vm0, %v860_v2  ;;  %v791_v3 = vld [vmem:[%s1347_s1 + $0x30] sm:$0xff]   ;;  %vm271_vm2 = vcmask 1041408  }
   0x2   :  { %28 = vst.msk [vmem:[#allocation2 + $0x10] sm:$0xff] %vm25_vm0, %v860_v2  ;;  %29 = vst.msk [vmem:[#allocation2 + $0x18] sm:$0xff] %vm25_vm0, %v860_v2  ;;  %276 = vmatpush1.bf16.msra.mxu0 %v790_v1  ;;  %775 = vmatpush1.bf16.msra.mxu1 %v790_v1  ;;  %v792_v4 = vld [vmem:[%s1347_s1 + $0x28] sm:$0xff]   ;;  %v793_v5 = vld [vmem:[%s1347_s1 + $0x20] sm:$0xff]  }
   0x3   :  { %30 = vst.msk [vmem:[#allocation2 + $0x20] sm:$0xff] %vm25_vm0, %v860_v2  ;;  %31 = vst.msk [vmem:[#allocation2 + $0x28] sm:$0xff] %vm25_vm0, %v860_v2  ;;  %277 = vmatprep.subr.bf16.mxu0 %v859_v0  ;;  %763 = vmatprep.subr.bf16.mxu1 %v859_v0  ;;  %v805_v6 = vld [vmem:[%s1348_s0 + $0x4] ss:$8 sps:$4 sm:$0xff]   ;;  %v794_v7 = vld [vmem:[%s1347_s1 + $0x18] sm:$0xff]  }
   0x4   :  { %32 = vst.msk [vmem:[#allocation2 + $0x30] sm:$0xff] %vm25_vm0, %v860_v2  ;;  %33 = vst.msk [vmem:[#allocation2 + $0x38] sm:$0xff] %vm25_vm0, %v860_v2  ;;  %v808_v8 = vld [vmem:[%s1348_s0 + $0x44] ss:$8 sps:$4 sm:$0xff]   ;;  %751 = vmatprep.mubr.msk.bf16.mxu0 %vm246_vm1, %v805_v6  ;;  %v795_v9 = vld [vmem:[%s1347_s1 + $0x10] sm:$0xff]  }
   0x5   :  { %34 = vst.msk [vmem:[#allocation2 + $0x40] sm:$0xff] %vm25_vm0, %v860_v2  ;;  %35 = vst.msk [vmem:[#allocation2 + $0x48] sm:$0xff] %vm25_vm0, %v860_v2  ;;  %755 = vmatprep.mubr.msk.bf16.mxu1 %vm246_vm1, %v808_v8  ;;  %v796_v10 = vld [vmem:[%s1347_s1 + $0x8] sm:$0xff]   ;;  %v797_v11 = vld [vmem:[%s1347_s1] sm:$0xff]  }
   0x6   :  { %36 = vst.msk [vmem:[#allocation2 + $0x50] sm:$0xff] %vm25_vm0, %v860_v2  ;;  %37 = vst.msk [vmem:[#allocation2 + $0x58] sm:$0xff] %vm25_vm0, %v860_v2  ;;  %278 = vmatpush1.bf16.msra.mxu0 %v791_v3  ;;  %776 = vmatpush1.bf16.msra.mxu1 %v791_v3  ;;  %v798_v12 = vld [vmem:[%s1347_s1 + $0x60] ss:$0 sps:$4 sm:$0x33]   ;;  %v799_v14 = vld [vmem:[%s1347_s1 + $0x58] sm:$0xff]  }
   0x7   :  { %38 = vst.msk [vmem:[#allocation2 + $0x60] sm:$0xff] %vm25_vm0, %v860_v2  ;;  %39 = vst.msk [vmem:[#allocation2 + $0x68] sm:$0xff] %vm25_vm0, %v860_v2  ;;  %279 = vmatprep.subr.bf16.mxu0 %v859_v0  ;;  %764 = vmatprep.subr.bf16.mxu1 %v859_v0  ;;  %v273_v13 = vsel %vm271_vm2, %v798_v12, 0  ;;  %v800_v15 = vld [vmem:[%s1347_s1 + $0x50] sm:$0xff]   ;;  %v801_v16 = vld [vmem:[%s1347_s1 + $0x48] sm:$0xff]  }
   0x8   :  { %40 = vst.msk [vmem:[#allocation2 + $0x70] sm:$0xff] %vm25_vm0, %v860_v2  ;;  %41 = vst.msk [vmem:[#allocation2 + $0x78] sm:$0xff] %vm25_vm0, %v860_v2  ;;  %v802_v17 = vld [vmem:[%s1347_s1 + $0x40] sm:$0xff]   ;;  %v809_v20 = vld [vmem:[%s1348_s0 + $0x14] ss:$8 sps:$4 sm:$0xff]  }
   0x9   :  { %v803_v18 = vld [vmem:[%s1348_s0] ss:$8 sps:$4 sm:$0xff]   ;;  %v812_v21 = vld [vmem:[%s1348_s0 + $0x54] ss:$8 sps:$4 sm:$0xff]   ;;  %v811_v22 = vld [vmem:[%s1348_s0 + $0x10] ss:$8 sps:$4 sm:$0xff]  }
   0xa   :  { %280 = vmatpush1.bf16.msra.mxu0 %v792_v4  ;;  %777 = vmatpush1.bf16.msra.mxu1 %v792_v4  ;;  %v806_v19 = vld [vmem:[%s1348_s0 + $0x40] ss:$8 sps:$4 sm:$0xff]   ;;  %v814_v23 = vld [vmem:[%s1348_s0 + $0x50] ss:$8 sps:$4 sm:$0xff]   ;;  %v815_v24 = vld [vmem:[%s1348_s0 + $0x24] ss:$8 sps:$4 sm:$0xff]  }
   0xb   :  { %281 = vmatprep.subr.bf16.mxu0 %v859_v0  ;;  %765 = vmatprep.subr.bf16.mxu1 %v859_v0  ;;  %v818_v25 = vld [vmem:[%s1348_s0 + $0x64] ss:$8 sps:$4 sm:$0xff]   ;;  %v817_v26 = vld [vmem:[%s1348_s0 + $0x20] ss:$8 sps:$4 sm:$0xff]   ;;  %v821_v28 = vld [vmem:[%s1348_s0 + $0x34] ss:$8 sps:$4 sm:$0xff]  }
   0xc   :  { %v820_v27 = vld [vmem:[%s1348_s0 + $0x60] ss:$8 sps:$4 sm:$0xff]   ;;  %v824_v29 = vld [vmem:[%s1348_s0 + $0x74] ss:$8 sps:$4 sm:$0xff]   ;;  %v823_v30 = vld [vmem:[%s1348_s0 + $0x30] ss:$8 sps:$4 sm:$0xff]  }
   0xd   :  { %v826_v31 = vld [vmem:[%s1348_s0 + $0x70] ss:$8 sps:$4 sm:$0xff]   ;;  %v83_v32 = vld [vmem:[#allocation2] sm:$0xff]  ;;  %v84_v40 = vld [vmem:[#allocation2 + $0x8] sm:$0xff] }
   0xe   :  { %282 = vmatpush1.bf16.msra.mxu0 %v793_v5  ;;  %778 = vmatpush1.bf16.msra.mxu1 %v793_v5  ;;  %v91_v33 = vld [vmem:[#allocation2 + $0x40] sm:$0xff]  ;;  %v92_v41 = vld [vmem:[#allocation2 + $0x48] sm:$0xff]  ;;  %v85_v48 = vld [vmem:[#allocation2 + $0x10] sm:$0xff] }
   0xf   :  { %283 = vmatprep.subr.bf16.mxu0 %v859_v0  ;;  %766 = vmatprep.subr.bf16.mxu1 %v859_v0  ;;  %v93_v49 = vld [vmem:[#allocation2 + $0x50] sm:$0xff]  ;;  %v1035_v52 = vld [vmem:[%s1349_s2] ss:$0 sm:$0xff]  ;;  %v86_v55 = vld [vmem:[#allocation2 + $0x18] sm:$0xff] }
  0x10   :  { %v94_v58 = vld [vmem:[#allocation2 + $0x58] sm:$0xff]  ;;  %v87_v4 = vld [vmem:[#allocation2 + $0x20] sm:$0xff] }
  0x11   :  { %v95_v8 = vld [vmem:[#allocation2 + $0x60] sm:$0xff] }
  0x12   :  { %284 = vmatpush1.bf16.msra.mxu0 %v794_v7  ;;  %779 = vmatpush1.bf16.msra.mxu1 %v794_v7 }
  0x13   :  { %285 = vmatprep.subr.bf16.mxu0 %v859_v0  ;;  %767 = vmatprep.subr.bf16.mxu1 %v859_v0 }
  0x16   :  { %286 = vmatpush1.bf16.msra.mxu0 %v795_v9  ;;  %780 = vmatpush1.bf16.msra.mxu1 %v795_v9 }
  0x17   :  { %287 = vmatprep.subr.bf16.mxu0 %v859_v0  ;;  %768 = vmatprep.subr.bf16.mxu1 %v859_v0 }
  0x1a   :  { %288 = vmatpush1.bf16.msra.mxu0 %v796_v10  ;;  %781 = vmatpush1.bf16.msra.mxu1 %v796_v10 }
  0x1b   :  { %289 = vmatprep.subr.bf16.mxu0 %v859_v0  ;;  %769 = vmatprep.subr.bf16.mxu1 %v859_v0 }
  0x1e   :  { %290 = vmatpush1.bf16.msra.mxu0 %v797_v11  ;;  %782 = vmatpush1.bf16.msra.mxu1 %v797_v11 }
  0x1f   :  { %297 = vmatprep.subr.bf16.mxu0 %v859_v0  ;;  %770 = vmatprep.subr.bf16.mxu1 %v859_v0 }
  0x22   :  { %298 = vmatpush2.bf16.msra.mxu0 %v273_v13  ;;  %783 = vmatpush2.bf16.msra.mxu1 %v273_v13 }
  0x23   :  { %299 = vmatprep.subr.bf16.mxu0 %v859_v0  ;;  %771 = vmatprep.subr.bf16.mxu1 %v859_v0 }
  0x26   :  { %300 = vmatpush2.bf16.msra.mxu0 %v799_v14  ;;  %784 = vmatpush2.bf16.msra.mxu1 %v799_v14 }
  0x27   :  { %301 = vmatprep.subr.bf16.mxu0 %v859_v0  ;;  %772 = vmatprep.subr.bf16.mxu1 %v859_v0 }
  0x2a   :  { %302 = vmatpush2.bf16.msra.mxu0 %v800_v15  ;;  %785 = vmatpush2.bf16.msra.mxu1 %v800_v15 }
  0x2b   :  { %303 = vmatprep.subr.bf16.mxu0 %v859_v0  ;;  %773 = vmatprep.subr.bf16.mxu1 %v859_v0 }
  0x2e   :  { %304 = vmatpush2.bf16.msra.mxu0 %v801_v16  ;;  %786 = vmatpush2.bf16.msra.mxu1 %v801_v16 }
  0x2f   :  { %305 = vmatprep.subr.bf16.mxu0 %v859_v0  ;;  %774 = vmatprep.subr.bf16.mxu1 %v859_v0 }
  0x32   :  { %306 = vmatpush2.bf16.msra.mxu0 %v802_v17  ;;  %787 = vmatpush2.bf16.msra.mxu1 %v802_v17  ;;  %v88_v17 = vld [vmem:[#allocation2 + $0x28] sm:$0xff] }
  0x35   :  { %308 = vmatmul.mubr.bf16.vlgmr.msra.gmra.mxu0 %v803_v18  ;;  %340 = vmatmul.mubr.bf16.vlgmr.msra.gmra.mxu1 %v806_v19 }
  0x36   :  { %752 = vmatprep.mubr.msk.bf16.mxu0 %vm246_vm1, %v809_v20  ;;  %756 = vmatprep.mubr.msk.bf16.mxu1 %vm246_vm1, %v812_v21  ;;  %v96_v21 = vld [vmem:[#allocation2 + $0x68] sm:$0xff] }
  0x3d   :  { %316 = vmatmul.mubr.bf16.gmra.mxu0 %v811_v22  ;;  %348 = vmatmul.mubr.bf16.gmra.mxu1 %v814_v23 }
  0x3e   :  { %753 = vmatprep.mubr.msk.bf16.mxu0 %vm246_vm1, %v815_v24  ;;  %757 = vmatprep.mubr.msk.bf16.mxu1 %vm246_vm1, %v818_v25 }
  0x45   :  { %324 = vmatmul.mubr.bf16.gmra.mxu0 %v817_v26  ;;  %356 = vmatmul.mubr.bf16.gmra.mxu1 %v820_v27 }
  0x46   :  { %754 = vmatprep.mubr.msk.bf16.mxu0 %vm246_vm1, %v821_v28  ;;  %758 = vmatprep.mubr.msk.bf16.mxu1 %vm246_vm1, %v824_v29 }
  0x4d   :  { %332 = vmatmul.mubr.bf16.gmra.mxu0 %v823_v30  ;;  %364 = vmatmul.mubr.bf16.gmra.mxu1 %v826_v31 }
  0xf5   :  { %v309_v34 = vpop.f32.mrf.mxu0  ;;  %v341_v35 = vpop.f32.mrf.mxu1 }
  0xf6   :  { %v372_v36 = vadd.f32 %v309_v34, %v83_v32  ;;  %v380_v37 = vadd.f32 %v341_v35, %v91_v33  ;;  %v89_v32 = vld [vmem:[#allocation2 + $0x30] sm:$0xff] }
  0xf7   :  { %v311_v38 = vpop.f32.mrf.mxu0  ;;  %v343_v39 = vpop.f32.mrf.mxu1  ;;  %v97_v35 = vld [vmem:[#allocation2 + $0x70] sm:$0xff] }
  0xf8   :  { %389 = vst.msk [vmem:[#allocation2] sm:$0xff] %vm25_vm0, %v372_v36  ;;  %397 = vst.msk [vmem:[#allocation2 + $0x40] sm:$0xff] %vm25_vm0, %v380_v37 }
  0xf9   :  { %v312_v42 = vpop.f32.mrf.mxu0  ;;  %v344_v43 = vpop.f32.mrf.mxu1 }
  0xfa   :  { %v373_v44 = vadd.f32 %v312_v42, %v84_v40  ;;  %v381_v45 = vadd.f32 %v344_v43, %v92_v41 }
  0xfb   :  { %v314_v46 = vpop.f32.mrf.mxu0  ;;  %v346_v47 = vpop.f32.mrf.mxu1 }
  0xfc   :  { %390 = vst.msk [vmem:[#allocation2 + $0x8] sm:$0xff] %vm25_vm0, %v373_v44  ;;  %398 = vst.msk [vmem:[#allocation2 + $0x48] sm:$0xff] %vm25_vm0, %v381_v45  ;;  %v90_v46 = vld [vmem:[#allocation2 + $0x38] sm:$0xff] }
  0xfd   :  { %v317_v50 = vpop.f32.mrf.mxu0  ;;  %v349_v51 = vpop.f32.mrf.mxu1 }
  0xfe   :  { %v374_v53 = vadd.f32 %v317_v50, %v85_v48  ;;  %v382_v54 = vadd.f32 %v349_v51, %v93_v49  ;;  %v98_v49 = vld [vmem:[#allocation2 + $0x78] sm:$0xff] }
  0xff   :  { %v319_v56 = vpop.f32.mrf.mxu0  ;;  %v351_v57 = vpop.f32.mrf.mxu1  ;;  %v408_v59 = vld [vmem:[#allocation2] sm:$0xff] }
 0x100   :  { %v416_v60 = vld [vmem:[#allocation2 + $0x40] sm:$0xff]  ;;  %391 = vst.msk [vmem:[#allocation2 + $0x10] sm:$0xff] %vm25_vm0, %v374_v53  ;;  %399 = vst.msk [vmem:[#allocation2 + $0x50] sm:$0xff] %vm25_vm0, %v382_v54  ;;  %v1040_v61 = vadd.f32 %v1035_v52, %v408_v59 }
 0x101   :  { %v1043_v62 = vadd.f32 %v1035_v52, %v416_v60  ;;  %v320_v63 = vpop.f32.mrf.mxu0  ;;  %v352_v0 = vpop.f32.mrf.mxu1 }
 0x102   :  { %v375_v1 = vadd.f32 %v320_v63, %v86_v55  ;;  %v383_v2 = vadd.f32 %v352_v0, %v94_v58  ;;  %v447_v3 = vsel %vm25_vm0, %v1040_v61, 0.0 }
 0x103   :  { %448 = vadd.xlane.f32.xlu0 %v447_v3  ;;  %v322_v5 = vpop.f32.mrf.mxu0  ;;  %v354_v6 = vpop.f32.mrf.mxu1  ;;  %v417_v7 = vld [vmem:[#allocation2 + $0x48] sm:$0xff]  ;;  %v471_v11 = vsel %vm25_vm0, %v1043_v62, 0.0 }
 0x104   :  { %v409_v9 = vld [vmem:[#allocation2 + $0x8] sm:$0xff]  ;;  %392 = vst.msk [vmem:[#allocation2 + $0x18] sm:$0xff] %vm25_vm0, %v375_v1  ;;  %400 = vst.msk [vmem:[#allocation2 + $0x58] sm:$0xff] %vm25_vm0, %v383_v2  ;;  %v1050_v10 = vadd.f32 %v1035_v52, %v417_v7 }
 0x105   :  { %v325_v12 = vpop.f32.mrf.mxu0  ;;  %v357_v13 = vpop.f32.mrf.mxu1  ;;  %v1057_v18 = vadd.f32 %v1035_v52, %v409_v9 }
 0x106   :  { %v376_v14 = vadd.f32 %v325_v12, %v87_v4  ;;  %v474_v15 = vsel %vm25_vm0, %v1050_v10, 0.0  ;;  %v384_v16 = vadd.f32 %v357_v13, %v95_v8 }
 0x107   :  { %475 = vadd.xlane.f32.xlu1 %v474_v15  ;;  %472 = vadd.xlane.f32.xlu0 %v471_v11  ;;  %v327_v19 = vpop.f32.mrf.mxu0  ;;  %v359_v20 = vpop.f32.mrf.mxu1  ;;  %v410_v22 = vld [vmem:[#allocation2 + $0x10] sm:$0xff]  ;;  %v450_v30 = vsel %vm25_vm0, %v1057_v18, 0.0 }
 0x108   :  { %v418_v23 = vld [vmem:[#allocation2 + $0x50] sm:$0xff]  ;;  %393 = vst.msk [vmem:[#allocation2 + $0x20] sm:$0xff] %vm25_vm0, %v376_v14  ;;  %401 = vst.msk [vmem:[#allocation2 + $0x60] sm:$0xff] %vm25_vm0, %v384_v16  ;;  %v1062_v24 = vadd.f32 %v1035_v52, %v410_v22 }
 0x109   :  { %v1065_v25 = vadd.f32 %v1035_v52, %v418_v23  ;;  %v328_v26 = vpop.f32.mrf.mxu0  ;;  %v360_v27 = vpop.f32.mrf.mxu1 }
 0x10a   :  { %v377_v28 = vadd.f32 %v328_v26, %v88_v17  ;;  %v385_v29 = vadd.f32 %v360_v27, %v96_v21  ;;  %v453_v31 = vsel %vm25_vm0, %v1062_v24, 0.0 }
 0x10b   :  { %451 = vadd.xlane.f32.xlu0 %v450_v30  ;;  %454 = vadd.xlane.f32.xlu1 %v453_v31  ;;  %v330_v33 = vpop.f32.mrf.mxu0  ;;  %v362_v34 = vpop.f32.mrf.mxu1  ;;  %v411_v36 = vld [vmem:[#allocation2 + $0x18] sm:$0xff]  ;;  %v477_v38 = vsel %vm25_vm0, %v1065_v25, 0.0 }
 0x10c   :  { %v419_v37 = vld [vmem:[#allocation2 + $0x58] sm:$0xff]  ;;  %394 = vst.msk [vmem:[#allocation2 + $0x28] sm:$0xff] %vm25_vm0, %v377_v28  ;;  %402 = vst.msk [vmem:[#allocation2 + $0x68] sm:$0xff] %vm25_vm0, %v385_v29  ;;  %v1076_v39 = vadd.f32 %v1035_v52, %v411_v36 }
 0x10d   :  { %v1079_v40 = vadd.f32 %v1035_v52, %v419_v37  ;;  %v333_v41 = vpop.f32.mrf.mxu0  ;;  %v365_v42 = vpop.f32.mrf.mxu1 }
 0x10e   :  { %v378_v43 = vadd.f32 %v333_v41, %v89_v32  ;;  %v386_v44 = vadd.f32 %v365_v42, %v97_v35  ;;  %v456_v45 = vsel %vm25_vm0, %v1076_v39, 0.0 }
 0x10f   :  { %478 = vadd.xlane.f32.xlu0 %v477_v38  ;;  %457 = vadd.xlane.f32.xlu1 %v456_v45  ;;  %v335_v47 = vpop.f32.mrf.mxu0  ;;  %v367_v48 = vpop.f32.mrf.mxu1  ;;  %v412_v50 = vld [vmem:[#allocation2 + $0x20] sm:$0xff]  ;;  %v480_v53 = vsel %vm25_vm0, %v1079_v40, 0.0 }
 0x110   :  { %v420_v51 = vld [vmem:[#allocation2 + $0x60] sm:$0xff]  ;;  %395 = vst.msk [vmem:[#allocation2 + $0x30] sm:$0xff] %vm25_vm0, %v378_v43  ;;  %403 = vst.msk [vmem:[#allocation2 + $0x70] sm:$0xff] %vm25_vm0, %v386_v44  ;;  %v1088_v54 = vadd.f32 %v1035_v52, %v412_v50 }
 0x111   :  { %v1091_v55 = vadd.f32 %v1035_v52, %v420_v51  ;;  %v336_v56 = vpop.f32.mrf.mxu0  ;;  %v368_v57 = vpop.f32.mrf.mxu1 }
 0x112   :  { %v379_v58 = vadd.f32 %v336_v56, %v90_v46  ;;  %v387_v59 = vadd.f32 %v368_v57, %v98_v49  ;;  %v459_v60 = vsel %vm25_vm0, %v1088_v54, 0.0 }
 0x113   :  { %481 = vadd.xlane.f32.xlu1 %v480_v53  ;;  %460 = vadd.xlane.f32.xlu0 %v459_v60  ;;  %v338_v63 = vpop.f32.mrf.mxu0  ;;  %v370_v0 = vpop.f32.mrf.mxu1  ;;  %v413_v1 = vld [vmem:[#allocation2 + $0x28] sm:$0xff]  ;;  %v483_v3 = vsel %vm25_vm0, %v1091_v55, 0.0 }
 0x114   :  { %v421_v2 = vld [vmem:[#allocation2 + $0x68] sm:$0xff]  ;;  %396 = vst.msk [vmem:[#allocation2 + $0x38] sm:$0xff] %vm25_vm0, %v379_v58  ;;  %404 = vst.msk [vmem:[#allocation2 + $0x78] sm:$0xff] %vm25_vm0, %v387_v59  ;;  %v1100_v4 = vadd.f32 %v1035_v52, %v413_v1 }
 0x115   :  { %v1103_v5 = vadd.f32 %v1035_v52, %v421_v2 }
 0x116   :  { %v462_v6 = vsel %vm25_vm0, %v1100_v4, 0.0 }
 0x117   :  { %484 = vadd.xlane.f32.xlu0 %v483_v3  ;;  %463 = vadd.xlane.f32.xlu1 %v462_v6  ;;  %v414_v7 = vld [vmem:[#allocation2 + $0x30] sm:$0xff]  ;;  %v486_v9 = vsel %vm25_vm0, %v1103_v5, 0.0 }
 0x118   :  { %v422_v8 = vld [vmem:[#allocation2 + $0x70] sm:$0xff]  ;;  %v1110_v11 = vadd.f32 %v1035_v52, %v414_v7 }
 0x119   :  { %v1113_v12 = vadd.f32 %v1035_v52, %v422_v8 }
 0x11a   :  { %v465_v13 = vsel %vm25_vm0, %v1110_v11, 0.0 }
 0x11b   :  { %487 = vadd.xlane.f32.xlu1 %v486_v9  ;;  %466 = vadd.xlane.f32.xlu0 %v465_v13  ;;  %v415_v14 = vld [vmem:[#allocation2 + $0x38] sm:$0xff]  ;;  %v489_v16 = vsel %vm25_vm0, %v1113_v12, 0.0 }
 0x11c   :  { %v423_v15 = vld [vmem:[#allocation2 + $0x78] sm:$0xff]  ;;  %v1120_v17 = vadd.f32 %v1035_v52, %v415_v14 }
 0x11d   :  { %v1123_v19 = vadd.f32 %v1035_v52, %v423_v15 }
 0x11e   :  { %v468_v20 = vsel %vm25_vm0, %v1120_v17, 0.0 }
 0x11f   :  { %490 = vadd.xlane.f32.xlu0 %v489_v16  ;;  %469 = vadd.xlane.f32.xlu1 %v468_v20  ;;  %v492_v21 = vsel %vm25_vm0, %v1123_v19, 0.0 }
 0x123   :  { %493 = vadd.xlane.f32.xlu1 %v492_v21 }
 0x18c   :  { %v449_v22 = vpop.xlane.xlu0 %448 }
 0x18d   :  { %v496_v23 = vmul.f32 0.0625, %v449_v22 }
 0x18f   :  { %v1130_v26 = vsub.f32 %v1040_v61, %v496_v23 }
 0x190   :  { %v476_v27 = vpop.xlane.xlu1 %475  ;;  %v473_v28 = vpop.xlane.xlu0 %472 }
 0x191   :  { %v504_v29 = vmul.f32 0.0625, %v473_v28  ;;  %v528_v52 = vmul.f32 %v1130_v26, %v1130_v26  ;;  %v505_v30 = vmul.f32 0.0625, %v476_v27 }
 0x193   :  { %v1135_v31 = vsub.f32 %v1043_v62, %v504_v29  ;;  %v544_v32 = vsel %vm25_vm0, %v528_v52, 0.0  ;;  %v1141_v37 = vsub.f32 %v1050_v10, %v505_v30 }
 0x194   :  { %v452_v33 = vpop.xlane.xlu0 %451  ;;  %v455_v34 = vpop.xlane.xlu1 %454  ;;  %545 = vadd.xlane.f32.xlu0 %v544_v32 }
 0x195   :  { %v497_v35 = vmul.f32 0.0625, %v452_v33  ;;  %v498_v36 = vmul.f32 0.0625, %v455_v34  ;;  %v536_v61 = vmul.f32 %v1135_v31, %v1135_v31 }
 0x197   :  { %v1144_v38 = vsub.f32 %v1057_v18, %v497_v35  ;;  %v1147_v41 = vsub.f32 %v1062_v24, %v498_v36  ;;  %v568_v62 = vsel %vm25_vm0, %v536_v61, 0.0  ;;  %v537_v18 = vmul.f32 %v1141_v37, %v1141_v37 }
 0x198   :  { %v479_v42 = vpop.xlane.xlu0 %478  ;;  %v458_v43 = vpop.xlane.xlu1 %457  ;;  %569 = vadd.xlane.f32.xlu0 %v568_v62 }
 0x199   :  { %v506_v44 = vmul.f32 0.0625, %v479_v42  ;;  %v499_v45 = vmul.f32 0.0625, %v458_v43  ;;  %v530_v46 = vmul.f32 %v1147_v41, %v1147_v41  ;;  %v529_v10 = vmul.f32 %v1144_v38, %v1144_v38 }
 0x19a   :  { %v571_v60 = vsel %vm25_vm0, %v537_v18, 0.0 }
 0x19b   :  { %v1157_v47 = vsub.f32 %v1065_v25, %v506_v44  ;;  %v1160_v24 = vsub.f32 %v1076_v39, %v499_v45  ;;  %v550_v48 = vsel %vm25_vm0, %v530_v46, 0.0  ;;  %v547_v49 = vsel %vm25_vm0, %v529_v10, 0.0 }
 0x19c   :  { %v482_v50 = vpop.xlane.xlu1 %481  ;;  %v461_v51 = vpop.xlane.xlu0 %460  ;;  %551 = vadd.xlane.f32.xlu0 %v550_v48  ;;  %548 = vadd.xlane.f32.xlu1 %v547_v49 }
 0x19d   :  { %v507_v53 = vmul.f32 0.0625, %v482_v50  ;;  %v500_v56 = vmul.f32 0.0625, %v461_v51  ;;  %v538_v57 = vmul.f32 %v1157_v47, %v1157_v47  ;;  %v531_v25 = vmul.f32 %v1160_v24, %v1160_v24 }
 0x19f   :  { %v1169_v58 = vsub.f32 %v1079_v40, %v507_v53  ;;  %v1172_v39 = vsub.f32 %v1088_v54, %v500_v56  ;;  %v574_v59 = vsel %vm25_vm0, %v538_v57, 0.0  ;;  %v553_v6 = vsel %vm25_vm0, %v531_v25, 0.0 }
 0x1a0   :  { %v485_v63 = vpop.xlane.xlu0 %484  ;;  %v464_v0 = vpop.xlane.xlu1 %463  ;;  %575 = vadd.xlane.f32.xlu0 %v574_v59  ;;  %572 = vadd.xlane.f32.xlu1 %v571_v60 }
 0x1a1   :  { %v508_v1 = vmul.f32 0.0625, %v485_v63  ;;  %v501_v2 = vmul.f32 0.0625, %v464_v0  ;;  %v532_v3 = vmul.f32 %v1172_v39, %v1172_v39  ;;  %v539_v8 = vmul.f32 %v1169_v58, %v1169_v58 }
 0x1a3   :  { %v1180_v40 = vsub.f32 %v1091_v55, %v508_v1  ;;  %v1183_v54 = vsub.f32 %v1100_v4, %v501_v2  ;;  %v556_v7 = vsel %vm25_vm0, %v532_v3, 0.0  ;;  %v577_v22 = vsel %vm25_vm0, %v539_v8, 0.0 }
 0x1a4   :  { %v488_v9 = vpop.xlane.xlu1 %487  ;;  %557 = vadd.xlane.f32.xlu0 %v556_v7  ;;  %v467_v13 = vpop.xlane.xlu0 %466  ;;  %554 = vadd.xlane.f32.xlu1 %v553_v6 }
 0x1a5   :  { %v509_v14 = vmul.f32 0.0625, %v488_v9  ;;  %v502_v15 = vmul.f32 0.0625, %v467_v13  ;;  %v540_v16 = vmul.f32 %v1180_v40, %v1180_v40  ;;  %v533_v55 = vmul.f32 %v1183_v54, %v1183_v54  ;;  %v1228_v9 = vld [vmem:[%s1350_s3] ss:$0 sm:$0xff] }
 0x1a7   :  { %v1193_v4 = vsub.f32 %v1103_v5, %v509_v14  ;;  %v1196_v20 = vsub.f32 %v1110_v11, %v502_v15  ;;  %v580_v21 = vsel %vm25_vm0, %v540_v16, 0.0  ;;  %v559_v30 = vsel %vm25_vm0, %v533_v55, 0.0  ;;  %v1234_v16 = vld [vmem:[%s1351_s4] ss:$0 sm:$0xff] }
 0x1a8   :  { %581 = vadd.xlane.f32.xlu0 %v580_v21  ;;  %v491_v23 = vpop.xlane.xlu0 %490  ;;  %578 = vadd.xlane.f32.xlu1 %v577_v22  ;;  %v470_v27 = vpop.xlane.xlu1 %469 }
 0x1a9   :  { %v510_v28 = vmul.f32 0.0625, %v491_v23  ;;  %v503_v29 = vmul.f32 0.0625, %v470_v27  ;;  %v534_v52 = vmul.f32 %v1196_v20, %v1196_v20  ;;  %v541_v33 = vmul.f32 %v1193_v4, %v1193_v4 }
 0x1ab   :  { %v1204_v5 = vsub.f32 %v1113_v12, %v510_v28  ;;  %v1207_v11 = vsub.f32 %v1120_v17, %v503_v29  ;;  %v562_v32 = vsel %vm25_vm0, %v534_v52, 0.0  ;;  %v583_v17 = vsel %vm25_vm0, %v541_v33, 0.0 }
 0x1ac   :  { %563 = vadd.xlane.f32.xlu0 %v562_v32  ;;  %560 = vadd.xlane.f32.xlu1 %v559_v30  ;;  %v494_v34 = vpop.xlane.xlu1 %493 }
 0x1ad   :  { %v511_v35 = vmul.f32 0.0625, %v494_v34  ;;  %v542_v36 = vmul.f32 %v1204_v5, %v1204_v5  ;;  %v535_v62 = vmul.f32 %v1207_v11, %v1207_v11 }
 0x1af   :  { %v1215_v61 = vsub.f32 %v1123_v19, %v511_v35  ;;  %v586_v12 = vsel %vm25_vm0, %v542_v36, 0.0  ;;  %v565_v42 = vsel %vm25_vm0, %v535_v62, 0.0 }
 0x1b0   :  { %587 = vadd.xlane.f32.xlu0 %v586_v12  ;;  %584 = vadd.xlane.f32.xlu1 %v583_v17 }
 0x1b1   :  { %v543_v43 = vmul.f32 %v1215_v61, %v1215_v61 }
 0x1b3   :  { %v589_v44 = vsel %vm25_vm0, %v543_v43, 0.0 }
 0x1b4   :  { %566 = vadd.xlane.f32.xlu1 %v565_v42 }
 0x1b8   :  { %590 = vadd.xlane.f32.xlu1 %v589_v44 }
 0x21d   :  { %v546_v19 = vpop.xlane.xlu0 %545 }
 0x21e   :  { %v592_v45 = vmul.f32 0.0625, %v546_v19 }
 0x220   :  { %v608_v46 = vadd.f32 1e-05, %v592_v45 }
 0x221   :  { %v570_v10 = vpop.xlane.xlu0 %569 }
 0x222   :  { %827 = vrsqrt.f32 %v608_v46  ;;  %v600_v18 = vmul.f32 0.0625, %v570_v10 }
 0x224   :  { %v616_v48 = vadd.f32 1e-05, %v600_v18 }
 0x225   :  { %v552_v49 = vpop.xlane.xlu0 %551  ;;  %v549_v50 = vpop.xlane.xlu1 %548 }
 0x226   :  { %829 = vrsqrt.f32 %v616_v48  ;;  %v594_v51 = vmul.f32 0.0625, %v552_v49  ;;  %v593_v53 = vmul.f32 0.0625, %v549_v50 }
 0x228   :  { %v610_v56 = vadd.f32 1e-05, %v594_v51  ;;  %v609_v57 = vadd.f32 1e-05, %v593_v53 }
 0x229   :  { %v576_v25 = vpop.xlane.xlu0 %575  ;;  %v573_v59 = vpop.xlane.xlu1 %572 }
 0x22a   :  { %831 = vrsqrt.f32 %v610_v56  ;;  %v602_v60 = vmul.f32 0.0625, %v576_v25  ;;  %v601_v63 = vmul.f32 0.0625, %v573_v59 }
 0x22b   :  { %833 = vrsqrt.f32 %v609_v57 }
 0x22c   :  { %v618_v0 = vadd.f32 1e-05, %v602_v60  ;;  %v617_v1 = vadd.f32 1e-05, %v601_v63 }
 0x22d   :  { %v558_v2 = vpop.xlane.xlu0 %557  ;;  %v555_v3 = vpop.xlane.xlu1 %554 }
 0x22e   :  { %835 = vrsqrt.f32 %v618_v0  ;;  %v596_v6 = vmul.f32 0.0625, %v558_v2  ;;  %v595_v7 = vmul.f32 0.0625, %v555_v3 }
 0x22f   :  { %v828_v8 = vpop.eup %827  ;;  %837 = vrsqrt.f32 %v617_v1 }
 0x230   :  { %v640_v13 = vmul.f32 %v828_v8, %v1130_v26  ;;  %v612_v14 = vadd.f32 1e-05, %v596_v6  ;;  %v611_v15 = vadd.f32 1e-05, %v595_v7 }
 0x231   :  { %v582_v55 = vpop.xlane.xlu0 %581  ;;  %v579_v21 = vpop.xlane.xlu1 %578 }
 0x232   :  { %v663_v22 = vmul.f32 %v1228_v9, %v640_v13  ;;  %839 = vrsqrt.f32 %v612_v14  ;;  %v604_v23 = vmul.f32 0.0625, %v582_v55  ;;  %v603_v27 = vmul.f32 0.0625, %v579_v21 }
 0x233   :  { %v830_v28 = vpop.eup %829  ;;  %841 = vrsqrt.f32 %v611_v15 }
 0x234   :  { %v686_v29 = vadd.f32 %v1234_v16, %v663_v22  ;;  %v648_v26 = vmul.f32 %v830_v28, %v1135_v31  ;;  %v620_v52 = vadd.f32 1e-05, %v604_v23  ;;  %v619_v30 = vadd.f32 1e-05, %v603_v27 }
 0x235   :  { %v564_v32 = vpop.xlane.xlu0 %563  ;;  %v561_v33 = vpop.xlane.xlu1 %560 }
 0x236   :  { %702 = vst.msk [vmem:[%s1352_s5] sm:$0xff] %vm25_vm0, %v686_v29  ;;  %v671_v34 = vmul.f32 %v1228_v9, %v648_v26  ;;  %843 = vrsqrt.f32 %v620_v52  ;;  %v598_v35 = vmul.f32 0.0625, %v564_v32  ;;  %v597_v36 = vmul.f32 0.0625, %v561_v33 }
 0x237   :  { %v832_v12 = vpop.eup %831  ;;  %845 = vrsqrt.f32 %v619_v30 }
 0x238   :  { %v834_v17 = vpop.eup %833  ;;  %v694_v62 = vadd.f32 %v1234_v16, %v671_v34  ;;  %v642_v31 = vmul.f32 %v832_v12, %v1147_v41  ;;  %v614_v42 = vadd.f32 1e-05, %v598_v35  ;;  %v613_v43 = vadd.f32 1e-05, %v597_v36 }
 0x239   :  { %v641_v44 = vmul.f32 %v834_v17, %v1144_v38  ;;  %v588_v19 = vpop.xlane.xlu0 %587  ;;  %v585_v45 = vpop.xlane.xlu1 %584 }
 0x23a   :  { %710 = vst.msk [vmem:[%s1352_s5 + $0x40] sm:$0xff] %vm25_vm0, %v694_v62  ;;  %v665_v46 = vmul.f32 %v1228_v9, %v642_v31  ;;  %847 = vrsqrt.f32 %v614_v42  ;;  %v606_v10 = vmul.f32 0.0625, %v588_v19  ;;  %v605_v18 = vmul.f32 0.0625, %v585_v45 }
 0x23b   :  { %v836_v48 = vpop.eup %835  ;;  %v664_v49 = vmul.f32 %v1228_v9, %v641_v44  ;;  %849 = vrsqrt.f32 %v613_v43 }
 0x23c   :  { %v838_v41 = vpop.eup %837  ;;  %v688_v50 = vadd.f32 %v1234_v16, %v665_v46  ;;  %v650_v38 = vmul.f32 %v836_v48, %v1157_v47  ;;  %v622_v51 = vadd.f32 1e-05, %v606_v10  ;;  %v621_v53 = vadd.f32 1e-05, %v605_v18 }
 0x23d   :  { %v687_v56 = vadd.f32 %v1234_v16, %v664_v49  ;;  %v649_v57 = vmul.f32 %v838_v41, %v1141_v37  ;;  %v567_v25 = vpop.xlane.xlu1 %566 }
 0x23e   :  { %704 = vst.msk [vmem:[%s1352_s5 + $0x10] sm:$0xff] %vm25_vm0, %v688_v50  ;;  %v673_v59 = vmul.f32 %v1228_v9, %v650_v38  ;;  %851 = vrsqrt.f32 %v622_v51  ;;  %v599_v60 = vmul.f32 0.0625, %v567_v25 }
 0x23f   :  { %v840_v63 = vpop.eup %839  ;;  %703 = vst.msk [vmem:[%s1352_s5 + $0x8] sm:$0xff] %vm25_vm0, %v687_v56  ;;  %v672_v47 = vmul.f32 %v1228_v9, %v649_v57  ;;  %853 = vrsqrt.f32 %v621_v53 }
 0x240   :  { %v842_v37 = vpop.eup %841  ;;  %v696_v0 = vadd.f32 %v1234_v16, %v673_v59  ;;  %v644_v1 = vmul.f32 %v840_v63, %v1172_v39  ;;  %v615_v2 = vadd.f32 1e-05, %v599_v60 }
 0x241   :  { %v695_v3 = vadd.f32 %v1234_v16, %v672_v47  ;;  %v643_v6 = vmul.f32 %v842_v37, %v1160_v24  ;;  %v591_v7 = vpop.xlane.xlu1 %590 }
 0x242   :  { %712 = vst.msk [vmem:[%s1352_s5 + $0x50] sm:$0xff] %vm25_vm0, %v696_v0  ;;  %v667_v8 = vmul.f32 %v1228_v9, %v644_v1  ;;  %855 = vrsqrt.f32 %v615_v2  ;;  %v607_v13 = vmul.f32 0.0625, %v591_v7 }
 0x243   :  { %v844_v14 = vpop.eup %843  ;;  %711 = vst.msk [vmem:[%s1352_s5 + $0x48] sm:$0xff] %vm25_vm0, %v695_v3  ;;  %v666_v39 = vmul.f32 %v1228_v9, %v643_v6 }
 0x244   :  { %v846_v15 = vpop.eup %845  ;;  %v690_v24 = vadd.f32 %v1234_v16, %v667_v8  ;;  %v652_v55 = vmul.f32 %v844_v14, %v1180_v40  ;;  %v623_v21 = vadd.f32 1e-05, %v607_v13 }
 0x245   :  { %v689_v22 = vadd.f32 %v1234_v16, %v666_v39  ;;  %v651_v23 = vmul.f32 %v846_v15, %v1169_v58 }
 0x246   :  { %706 = vst.msk [vmem:[%s1352_s5 + $0x20] sm:$0xff] %vm25_vm0, %v690_v24  ;;  %v675_v27 = vmul.f32 %v1228_v9, %v652_v55  ;;  %857 = vrsqrt.f32 %v623_v21 }
 0x247   :  { %v848_v28 = vpop.eup %847  ;;  %705 = vst.msk [vmem:[%s1352_s5 + $0x18] sm:$0xff] %vm25_vm0, %v689_v22  ;;  %v674_v40 = vmul.f32 %v1228_v9, %v651_v23 }
 0x248   :  { %v850_v29 = vpop.eup %849  ;;  %v698_v26 = vadd.f32 %v1234_v16, %v675_v27  ;;  %v646_v58 = vmul.f32 %v848_v28, %v1196_v20 }
 0x249   :  { %v697_v52 = vadd.f32 %v1234_v16, %v674_v40  ;;  %v645_v30 = vmul.f32 %v850_v29, %v1183_v54 }
 0x24a   :  { %714 = vst.msk [vmem:[%s1352_s5 + $0x60] sm:$0xff] %vm25_vm0, %v698_v26  ;;  %v669_v32 = vmul.f32 %v1228_v9, %v646_v58 }
 0x24b   :  { %v852_v33 = vpop.eup %851  ;;  %713 = vst.msk [vmem:[%s1352_s5 + $0x58] sm:$0xff] %vm25_vm0, %v697_v52  ;;  %v668_v34 = vmul.f32 %v1228_v9, %v645_v30 }
 0x24c   :  { %v854_v20 = vpop.eup %853  ;;  %v692_v35 = vadd.f32 %v1234_v16, %v669_v32  ;;  %v654_v54 = vmul.f32 %v852_v33, %v1204_v5 }
 0x24d   :  { %v691_v36 = vadd.f32 %v1234_v16, %v668_v34  ;;  %v653_v12 = vmul.f32 %v854_v20, %v1193_v4 }
 0x24e   :  { %708 = vst.msk [vmem:[%s1352_s5 + $0x30] sm:$0xff] %vm25_vm0, %v692_v35  ;;  %v677_v17 = vmul.f32 %v1228_v9, %v654_v54 }
 0x24f   :  { %v856_v62 = vpop.eup %855  ;;  %707 = vst.msk [vmem:[%s1352_s5 + $0x28] sm:$0xff] %vm25_vm0, %v691_v36  ;;  %v676_v31 = vmul.f32 %v1228_v9, %v653_v12 }
 0x250   :  { %v700_v5 = vadd.f32 %v1234_v16, %v677_v17  ;;  %v647_v42 = vmul.f32 %v856_v62, %v1207_v11 }
 0x251   :  { %v699_v4 = vadd.f32 %v1234_v16, %v676_v31 }
 0x252   :  { %716 = vst.msk [vmem:[%s1352_s5 + $0x70] sm:$0xff] %vm25_vm0, %v700_v5  ;;  %v670_v43 = vmul.f32 %v1228_v9, %v647_v42 }
 0x253   :  { %v858_v44 = vpop.eup %857  ;;  %715 = vst.msk [vmem:[%s1352_s5 + $0x68] sm:$0xff] %vm25_vm0, %v699_v4 }
 0x254   :  { %v693_v19 = vadd.f32 %v1234_v16, %v670_v43  ;;  %v655_v45 = vmul.f32 %v858_v44, %v1215_v61 }
 0x256   :  { %709 = vst.msk [vmem:[%s1352_s5 + $0x38] sm:$0xff] %vm25_vm0, %v693_v19  ;;  %v678_v11 = vmul.f32 %v1228_v9, %v655_v45 }
 0x258   :  { %v701_v46 = vadd.f32 %v1234_v16, %v678_v11 }
 0x25a   :  { %717 = vst.msk [vmem:[%s1352_s5 + $0x78] sm:$0xff] %vm25_vm0, %v701_v46 }

</bundles_post_ra>
